<compile_context>
chip_gen: v6e
topology: v6e:2x2x1
jax: 0.10.0
libtpu: 0.0.40
codegen_flags: <defaults>
</compile_context>

<pallas_src>
import jax
import jax.numpy as jnp
from jax.experimental import pallas as pl
from jax.experimental.pallas import tpu as pltpu


def _round_up(x, m):
    return ((x + m - 1) // m) * m


# --------------------------------------------------------------------------
# Kernels
# --------------------------------------------------------------------------
def _linear_kernel_single_k(x_ref, w_ref, b_ref, o_ref):
    # Whole K reduction in one block: no scratch accumulator round trip.
    acc = jnp.dot(x_ref[...], w_ref[...], preferred_element_type=jnp.float32)
    o_ref[...] = (acc + b_ref[...]).astype(o_ref.dtype)


def _linear_kernel_multi_k(x_ref, w_ref, b_ref, o_ref, acc_ref):
    # grid = (M tiles, N tiles, K tiles); K (reduction) is the innermost axis.
    k = pl.program_id(2)

    @pl.when(k == 0)
    def _init():
        # Seed the accumulator with the broadcast bias so the finalize step is
        # a pure cast + store (no extra VALU add / read-modify-write).
        acc_ref[...] = jnp.broadcast_to(b_ref[...], acc_ref.shape)

    acc_ref[...] += jnp.dot(
        x_ref[...], w_ref[...], preferred_element_type=jnp.float32
    )

    @pl.when(k == pl.num_programs(2) - 1)
    def _finalize():
        o_ref[...] = acc_ref[...].astype(o_ref.dtype)


# --------------------------------------------------------------------------
# Tiling heuristics
# --------------------------------------------------------------------------
def _vmem_budget_and_limit():
    """Per-generation VMEM budget for explicit buffers + scoped-VMEM limit."""
    cap = 64 << 20  # conservative default: smallest per-core VMEM (v7x)
    try:
        info = pltpu.get_tpu_info()
        cap = int(getattr(info, "vmem_capacity_bytes", cap)) or cap
    except Exception:
        pass
    budget = min(int(cap * 0.35), 48 << 20)   # v7x ~22 MiB, v5e/v6e ~45 MiB
    limit = min(int(cap * 0.75), 100 << 20)   # leave headroom for compiler scratch
    return budget, limit


def _footprint_bytes(tm, tk, tn, with_acc):
    # bf16 x/W blocks double-buffered, f32 output double-buffered, f32 bias,
    # optional f32 accumulator scratch.
    f = 2 * (tm * tk * 2) + 2 * (tk * tn * 2) + 2 * (tm * tn * 4) + 2 * (tn * 4)
    if with_acc:
        f += tm * tn * 4
    return f


def _choose_tiles(M, K, N, budget):
    """Pick (tm, tk, tn).  tm multiple of 16 (bf16 sublane), tk/tn of 128."""
    Mp16 = _round_up(M, 16)
    Kp128 = _round_up(K, 128)
    Np128 = _round_up(N, 128)

    # --- Strategy 1: whole weight resident in VMEM (single N and K block) ---
    # W and x are then streamed from HBM exactly once each.
    for cand in (1024, 512, 256):
        tm_c = min(cand, Mp16)
        if _footprint_bytes(tm_c, Kp128, Np128, with_acc=False) <= budget:
            tn_c = Np128
            # v7x has 2 TensorCores: if there is only one M block, split N so
            # both cores get a parallel block.
            if Mp16 <= tm_c and Np128 >= 256 and (Np128 // 2) % 128 == 0:
                tn_c = Np128 // 2
            return tm_c, Kp128, tn_c

    # --- Strategy 2: 3-D tiling with an f32 accumulator ---
    for tn in (1024, 512, 256, 128):
        tn = min(tn, Np128)
        for tm in (1024, 512, 256, 128, 64, 32, 16):
            tm = min(tm, Mp16)
            for tk in (2048, 1024, 512, 256, 128):
                tk = min(tk, Kp128)
                if _footprint_bytes(tm, tk, tn, with_acc=True) <= budget:
                    return tm, tk, tn

    # Fallback for pathologically small budgets.
    return min(16, Mp16), min(128, Kp128), min(128, Np128)


# --------------------------------------------------------------------------
# Wrapper
# --------------------------------------------------------------------------
def ecbd_converter_forward(x, weight, bias, *, compute_dtype=jnp.bfloat16,
                           max_tile_bytes=None):
    """y = x @ weight.T + bias (PyTorch nn.Linear forward) as a Pallas kernel.

    x:      [..., feat_in]
    weight: [feat_out, feat_in]   (nn.Linear convention)
    bias:   [feat_out]
    """
    orig_shape = x.shape
    feat_in = orig_shape[-1]
    feat_out = weight.shape[0]
    out_dtype = x.dtype

    x2 = x.reshape(-1, feat_in)
    M, K = x2.shape
    N = feat_out

    budget, vmem_limit = _vmem_budget_and_limit()
    if max_tile_bytes is not None:
        budget = min(budget, max_tile_bytes)
    tm, tk, tn = _choose_tiles(M, K, N, budget)

    # Pad only K (needed for a correct reduction); the pad fuses with the bf16
    # cast.  Ragged M/N edges are handled by the pl.cdiv grid below.
    Kp = _round_up(K, tk)
    wt = weight.T  # [feat_in, feat_out] -> plain (1,)x(0,) contraction in-kernel
    if Kp != K:
        x2 = jnp.pad(x2, ((0, 0), (0, Kp - K)))
        wt = jnp.pad(wt, ((0, Kp - K), (0, 0)))
    x2 = x2.astype(compute_dtype)
    wt = wt.astype(compute_dtype)
    b2 = bias.reshape(1, N).astype(jnp.float32)

    grid_m = pl.cdiv(M, tm)
    grid_n = pl.cdiv(N, tn)
    grid_k = Kp // tk

    # Honest HBM-traffic hint: x is re-read per N tile (if K is tiled), W per
    # M tile (if N or K is tiled), output written once.
    elem_in = jnp.dtype(compute_dtype).itemsize
    x_reads = grid_n if grid_k > 1 else 1
    w_reads = grid_m if (grid_n > 1 or grid_k > 1) else 1
    cost = pl.CostEstimate(
        flops=2 * M * Kp * N,
        transcendentals=0,
        bytes_accessed=int(
            M * Kp * elem_in * x_reads
            + Kp * N * elem_in * w_reads
            + N * 4 * grid_m
            + M * N * jnp.dtype(out_dtype).itemsize
        ),
    )

    if grid_k == 1:
        kernel = _linear_kernel_single_k
        grid = (grid_m, grid_n)
        in_specs = [
            pl.BlockSpec((tm, tk), lambda i, j: (i, 0)),   # x tile
            pl.BlockSpec((tk, tn), lambda i, j: (0, j)),   # W tile (pre-transposed)
            pl.BlockSpec((1, tn), lambda i, j: (0, j)),    # bias tile
        ]
        out_spec = pl.BlockSpec((tm, tn), lambda i, j: (i, j))
        scratch = []
        dim_sem = ("parallel", "parallel")
    else:
        kernel = _linear_kernel_multi_k
        grid = (grid_m, grid_n, grid_k)
        in_specs = [
            pl.BlockSpec((tm, tk), lambda i, j, k: (i, k)),
            pl.BlockSpec((tk, tn), lambda i, j, k: (k, j)),
            pl.BlockSpec((1, tn), lambda i, j, k: (0, j)),
        ]
        out_spec = pl.BlockSpec((tm, tn), lambda i, j, k: (i, j))
        scratch = [pltpu.VMEM((tm, tn), jnp.float32)]
        dim_sem = ("parallel", "parallel", "arbitrary")

    out = pl.pallas_call(
        kernel,
        out_shape=jax.ShapeDtypeStruct((M, N), out_dtype),
        grid_spec=pltpu.PrefetchScalarGridSpec(
            num_scalar_prefetch=0,
            grid=grid,
            in_specs=in_specs,
            out_specs=out_spec,
            scratch_shapes=scratch,
        ),
        compiler_params=pltpu.CompilerParams(
            dimension_semantics=dim_sem,
            vmem_limit_bytes=vmem_limit,
        ),
        cost_estimate=cost,
    )(x2, wt, b2)

    return out.reshape(*orig_shape[:-1], feat_out)


# --------------------------------------------------------------------------
# Self-test
# --------------------------------------------------------------------------
if __name__ == "__main__":
    key = jax.random.PRNGKey(0)

    # --- Small shapes consistent with the module (linear feat_in -> feat_out) ---
    B, feat_in, feat_out = 8, 32, 64
    kx, kw, kb, k2 = jax.random.split(key, 4)

    bound = 1.0 / jnp.sqrt(jnp.float32(feat_in))
    weight = jax.random.uniform(kw, (feat_out, feat_in), jnp.float32, -bound, bound)
    bias = jax.random.uniform(kb, (feat_out,), jnp.float32, -bound, bound)
    x = jax.random.normal(kx, (B, feat_in), jnp.float32)

    y = jax.block_until_ready(ecbd_converter_forward(x, weight, bias))
    y_ref = x @ weight.T + bias
    assert y.shape == (B, feat_out)
    assert jnp.allclose(y, y_ref, atol=2e-2, rtol=2e-2)

    # --- Larger ragged shapes: exercises K padding + ragged M/N boundary blocks ---
    M2, K2, N2 = 300, 1024, 300
    kx2, kw2, kb2 = jax.random.split(k2, 3)
    bound2 = 1.0 / jnp.sqrt(jnp.float32(K2))
    weight2 = jax.random.uniform(kw2, (N2, K2), jnp.float32, -bound2, bound2)
    bias2 = jax.random.uniform(kb2, (N2,), jnp.float32, -bound2, bound2)
    x2 = jax.random.normal(kx2, (M2, K2), jnp.float32)
    y2_ref = x2 @ weight2.T + bias2

    y2 = jax.block_until_ready(ecbd_converter_forward(x2, weight2, bias2))
    assert y2.shape == (M2, N2)
    # bf16 operands + f32 accumulate vs f32 XLA reference.
    assert jnp.allclose(y2, y2_ref, atol=5e-2, rtol=5e-2)

    # --- Force the multi-K accumulator path (small tile budget) ---
    y3 = jax.block_until_ready(
        ecbd_converter_forward(x2, weight2, bias2, max_tile_bytes=2 << 20)
    )
    assert jnp.allclose(y3, y2_ref, atol=5e-2, rtol=5e-2)

    print("KERNEL_OK")
</pallas_src>

<mosaic_0001>
module attributes {stable_mosaic.version = 11 : i64} {
  func.func @_linear_kernel_single_k(%arg0: i32, %arg1: i32, %arg2: memref<16x128xbf16, #tpu.memory_space<vmem>>, %arg3: memref<128x128xbf16, #tpu.memory_space<vmem>>, %arg4: memref<1x128xf32, #tpu.memory_space<vmem>>, %arg5: memref<16x128xf32, #tpu.memory_space<vmem>>) attributes {dimension_semantics = [#tpu.dimension_semantics<parallel>, #tpu.dimension_semantics<parallel>], iteration_bounds = array<i64: 1, 1>, scalar_prefetch = 0 : i64, scratch_operands = 0 : i64, tpu.core_type = #tpu.core_type<tc>, window_params = [{transform_indices = @transform_0, window_bounds = array<i64: 16, 128>}, {transform_indices = @transform_1, window_bounds = array<i64: 128, 128>}, {transform_indices = @transform_2, window_bounds = array<i64: 1, 128>}, {transform_indices = @transform_3, window_bounds = array<i64: 16, 128>}]} {
    %c0 = arith.constant 0 : index
    %c0_0 = arith.constant 0 : index
    %0 = vector.load %arg2[%c0, %c0_0] : memref<16x128xbf16, #tpu.memory_space<vmem>>, vector<16x128xbf16>
    %c0_1 = arith.constant 0 : index
    %c0_2 = arith.constant 0 : index
    %1 = vector.load %arg3[%c0_1, %c0_2] : memref<128x128xbf16, #tpu.memory_space<vmem>>, vector<128x128xbf16>
    %cst = arith.constant dense<0.000000e+00> : vector<16x128xf32>
    %2 = tpu.matmul %0, %1, %cst {dimension_numbers = #tpu.dot_dimension_numbers<[1], [0], [0], [1], [0, 0, 1, 1], [], []>} : vector<16x128xbf16>, vector<128x128xbf16>, vector<16x128xf32> -> vector<16x128xf32>
    %c0_3 = arith.constant 0 : index
    %c0_4 = arith.constant 0 : index
    %3 = vector.load %arg4[%c0_3, %c0_4] : memref<1x128xf32, #tpu.memory_space<vmem>>, vector<1x128xf32>
    %4 = vector.broadcast %3 : vector<1x128xf32> to vector<16x128xf32>
    %5 = arith.addf %2, %4 : vector<16x128xf32>
    %c0_5 = arith.constant 0 : index
    %c0_6 = arith.constant 0 : index
    %6 = vector.load %arg5[%c0_5, %c0_6] : memref<16x128xf32, #tpu.memory_space<vmem>>, vector<16x128xf32>
    tpu.vector_store %arg5[%c0_5, %c0_6], %5 {strides = array<i32>} : memref<16x128xf32, #tpu.memory_space<vmem>>, vector<16x128xf32>,
    return
  }
  func.func @transform_0(%arg0: i32, %arg1: i32) -> (i32, i32) {
    %c0_i32 = arith.constant 0 : i32
    %c0_i32_0 = arith.constant 0 : i32
    return %arg0, %c0_i32 : i32, i32
  }
  func.func @transform_1(%arg0: i32, %arg1: i32) -> (i32, i32) {
    %c0_i32 = arith.constant 0 : i32
    %c0_i32_0 = arith.constant 0 : i32
    return %c0_i32, %arg1 : i32, i32
  }
  func.func @transform_2(%arg0: i32, %arg1: i32) -> (i32, i32) {
    %c0_i32 = arith.constant 0 : i32
    %c0_i32_0 = arith.constant 0 : i32
    return %c0_i32, %arg1 : i32, i32
  }
  func.func @transform_3(%arg0: i32, %arg1: i32) -> (i32, i32) {
    %c0_i32 = arith.constant 0 : i32
    return %arg0, %arg1 : i32, i32
  }
}

</mosaic_0001>

<bundles_post_ra>
// kernel: tpu_custom_call.1
= control target key start
LH: loop header
LB: loop body
LE: loop exit
PB: predicated region body
PF: predicated region fallthrough
CT: control target
= control target key end

     0   :  { %8 = vsyncpa [#allocation3], 0  ;;  %v229_v1 = vmov 0.0   ;;  %vm230_vm0 = vmmov 0   ;;  %s287_s0 = inlined_call_operand.vmem [shape: bf16[8,128], index: 0, kind: input, shape index: {}]   ;;  %s288_s1 = inlined_call_operand.vmem [shape: bf16[128,64], index: 1, kind: input, shape index: {}]   ;;  %s289_s2 = inlined_call_operand.vmem [shape: f32[1,64], index: 2, kind: input, shape index: {}]   ;;  %s290_s3 = inlined_call_operand.hbm [shape: f32[8,64], index: 3, kind: output, shape index: {}]  }
   0x1   :  { %v198_v0 = vld [vmem:[%s288_s1 + $0x38] sm:$0xff]   ;;  %173 = vmatprep.subr.bf16.mxu0 %v229_v1  ;;  %v199_v2 = vld [vmem:[%s288_s1 + $0x30] sm:$0xff]   ;;  %189 = vmatprep.mubr.msk.bf16.mxu0 %vm230_vm0, %v229_v1  ;;  %v200_v3 = vld [vmem:[%s288_s1 + $0x28] sm:$0xff]  }
   0x2   :  { %174 = vmatpush3.bf16.msra.mxu0 %v198_v0  ;;  %v201_v4 = vld [vmem:[%s288_s1 + $0x20] sm:$0xff]   ;;  %v202_v5 = vld [vmem:[%s288_s1 + $0x18] sm:$0xff]   ;;  %v203_v6 = vld [vmem:[%s288_s1 + $0x10] sm:$0xff]  }
   0x3   :  { %175 = vmatprep.subr.bf16.mxu0 %v229_v1  ;;  %v204_v7 = vld [vmem:[%s288_s1 + $0x8] sm:$0xff]   ;;  %v205_v8 = vld [vmem:[%s288_s1] sm:$0xff]  }
   0x4   :  { %v206_v9 = vld [vmem:[%s287_s0] sm:$0xff]  }
   0x5   :  { %v154_v10 = vld [vmem:[%s289_s2] ss:$0 sm:$0xff] }
   0x6   :  { %176 = vmatpush3.bf16.msra.mxu0 %v199_v2 }
   0x7   :  { %177 = vmatprep.subr.bf16.mxu0 %v229_v1 }
   0xa   :  { %178 = vmatpush3.bf16.msra.mxu0 %v200_v3 }
   0xb   :  { %179 = vmatprep.subr.bf16.mxu0 %v229_v1 }
   0xe   :  { %180 = vmatpush3.bf16.msra.mxu0 %v201_v4 }
   0xf   :  { %181 = vmatprep.subr.bf16.mxu0 %v229_v1 }
  0x12   :  { %182 = vmatpush3.bf16.msra.mxu0 %v202_v5 }
  0x13   :  { %183 = vmatprep.subr.bf16.mxu0 %v229_v1 }
  0x16   :  { %184 = vmatpush3.bf16.msra.mxu0 %v203_v6 }
  0x17   :  { %185 = vmatprep.subr.bf16.mxu0 %v229_v1 }
  0x1a   :  { %186 = vmatpush3.bf16.msra.mxu0 %v204_v7 }
  0x1b   :  { %187 = vmatprep.subr.bf16.mxu0 %v229_v1 }
  0x1e   :  { %188 = vmatpush3.bf16.msra.mxu0 %v205_v8 }
  0x21   :  { %190 = vmatmul.mubr.bf16.vlgmr.msra.gmra.mxu0 %v206_v9 }
  0xe1   :  { %v129_v11 = vpop.f32.mrf.mxu0 }
  0xe2   :  { %v130_v12 = vadd.f32 %v154_v10, %v129_v11 }
  0xe3   :  { %v191_v13 = vpop.f32.mrf.mxu0 }
  0xe4   :  { %136 = vst [vmem:[#allocation2] sm:$0xff] %v130_v12 }
  0xe5   :  { %v132_v14 = vpop.f32.mrf.mxu0 }
  0xe6   :  { %v133_v15 = vadd.f32 %v154_v10, %v132_v14 }
  0xe7   :  { %v192_v16 = vpop.f32.mrf.mxu0 }
  0xe8   :  { %137 = vst [vmem:[#allocation2 + $0x8] sm:$0xff] %v133_v15 }
  0xe9   :  { %142 = vsyncadd [#allocation3], 128  ;;  %s231_s1 = smov [#allocation2]  }
  0xea   :  { %s143_s5 = sshll.u32 %s231_s1, 4  ;;  %s144_s5 = int_to_ptr.vmem [resolvable:$true] %s143_s5 }
  0xeb   :  { %s207_s6 = scalar_lea.vmem %s144_s5, 128  ;;  %s211_s0 = scalar_lea.vmem %s144_s5, 256 }
  0xec   :  { %p208_p0 = scmp.ne.s32.totalorder %s144_s5, %s207_s6  ;;  %p212_p1 = scmp.lt.s32.totalorder %s144_s5, %s144_s5 }
  0xed   :  { %p213_p2 = scmp.lt.s32.totalorder %s211_s0, %s207_s6 }
  0xef   :  { %p214_p3 = por %p213_p2, %p212_p1 }
  0xf1   :  { %p215_p4 = pnand %p214_p3, %p208_p0 }
  0xf3   :  { %218 = shalt.err (!%p215_p4)
}
  0xf4   :  { %s232_s2 = smov 128   ;;  %s233_s7 = smov 8  }
  0xf5   :  { %149 = dma.vmem_to_hbm [thread:$0]  %s144_s5, 128, %s290_s3, [#allocation3], %s232_s2, %s232_s2, %s233_s7  }
  0xf6   :  { %227 = dma.done.wait [#allocation3], 256  }
  0xf7   :  { %228 = vsyncadd [#allocation3], 4294967040 }
  0xf8   :  { %153 = vsyncpa [#allocation3], 1 }

</bundles_post_ra>
